<compile_context>
chip_gen: v7x
topology: tpu7x:2x2x1
jax: 0.10.0
libtpu: 0.0.40
codegen_flags: <defaults>
</compile_context>

<pallas_src>
import jax
import jax.numpy as jnp
from jax.experimental import pallas as pl
from jax.experimental.pallas import tpu as pltpu

HIDDEN = 4  # Linear(2, 4) -> Linear(4, 1)


def _mlp_kernel(w1_ref, b1_ref, w2_ref, b2_ref, xt_ref, o_ref):
    # SMEM scalars:  w1 (2, 4)  b1 (4,)  w2 (4,)  b2 (1,)
    # VMEM tiles:    xt (2, TB) f32      o (1, TB) f32
    x0 = xt_ref[0:1, :]                     # (1, TB) — feature 0, lane-dense
    x1 = xt_ref[1:2, :]                     # (1, TB) — feature 1, lane-dense

    y = jnp.full_like(x0, b2_ref[0])        # start from the output bias
    # Unrolled at trace time: 4 hidden units, pure VPU broadcast-FMAs.
    for j in range(HIDDEN):
        h = x0 * w1_ref[0, j] + x1 * w1_ref[1, j] + b1_ref[j]
        y = y + jnp.maximum(h, 0.0) * w2_ref[j]   # ReLU then second layer

    o_ref[...] = y


def net_forward(x, w1, b1, w2, b2, *, tb=256):
    """x: (B, 2) float32 -> (B, 1) float32.

    w1: (2, 4) = l1.weight.T, b1: (4,) = l1.bias,
    w2: (4,)   = l2.weight (flattened), b2: (1,) = l2.bias.
    """
    B = x.shape[0]
    grid_n = pl.cdiv(B, tb)
    Bp = grid_n * tb

    # Wrapper-side layout change: (B, 2) -> lane-dense (2, Bp), zero-padded.
    xt = jnp.zeros((2, Bp), jnp.float32).at[:, :B].set(x.T)

    smem = pl.BlockSpec(memory_space=pltpu.MemorySpace.SMEM)

    out = pl.pallas_call(
        _mlp_kernel,
        out_shape=jax.ShapeDtypeStruct((1, Bp), jnp.float32),
        grid=(grid_n,),
        in_specs=[
            smem,                                       # w1 (2, 4)
            smem,                                       # b1 (4,)
            smem,                                       # w2 (4,)
            smem,                                       # b2 (1,)
            pl.BlockSpec((2, tb), lambda i: (0, i)),    # xt tile, lane-dense
        ],
        out_specs=pl.BlockSpec((1, tb), lambda i: (0, i)),
        compiler_params=pltpu.CompilerParams(
            dimension_semantics=("parallel",),          # shards over 2 TCs on v7x
        ),
    )(w1, b1, w2, b2, xt)

    return out[0, :B].reshape(B, 1)


def init_params(key):
    """Deterministic init matching nn.Linear(2,4) and nn.Linear(4,1) shapes.

    PyTorch stores l1.weight as (4, 2) and l2.weight as (1, 4); we keep
    transposed / flattened layouts so the kernel does plain broadcast-FMAs.
    """
    k1, k2, k3, k4 = jax.random.split(key, 4)
    w1 = jax.random.uniform(k1, (2, HIDDEN), jnp.float32, -0.5, 0.5)  # l1.weight.T
    b1 = jax.random.uniform(k2, (HIDDEN,), jnp.float32, -0.5, 0.5)    # l1.bias
    w2 = jax.random.uniform(k3, (HIDDEN,), jnp.float32, -0.5, 0.5)    # l2.weight (flat)
    b2 = jax.random.uniform(k4, (1,), jnp.float32, -0.5, 0.5)         # l2.bias
    return w1, b1, w2, b2


if __name__ == "__main__":
    key = jax.random.PRNGKey(0)
    w1, b1, w2, b2 = init_params(key)

    # XOR-style 2-feature inputs; batch chosen so the lane-dense tiling
    # exercises a 2-step grid (2 x 256 lanes).
    B = 512
    x = jax.random.uniform(jax.random.fold_in(key, 99), (B, 2), jnp.float32)

    out = net_forward(x, w1, b1, w2, b2)
    jax.block_until_ready(out)

    # Pure-JAX reference (same math as the PyTorch forward).
    ref = jnp.maximum(x @ w1 + b1, 0.0) @ w2[:, None] + b2
    assert out.shape == (B, 1)
    assert jnp.allclose(out, ref, atol=1e-5), "mismatch vs reference"

    print("KERNEL_OK")
</pallas_src>

<mosaic_0001>
module attributes {stable_mosaic.version = 11 : i64} {
  func.func @_mlp_kernel(%arg0: i32, %arg1: memref<2x4xf32, #tpu.memory_space<smem>>, %arg2: memref<4xf32, #tpu.memory_space<smem>>, %arg3: memref<4xf32, #tpu.memory_space<smem>>, %arg4: memref<1xf32, #tpu.memory_space<smem>>, %arg5: memref<2x256xf32, #tpu.memory_space<vmem>>, %arg6: memref<1x256xf32, #tpu.memory_space<vmem>>) attributes {dimension_semantics = [#tpu.dimension_semantics<parallel>], iteration_bounds = array<i64: 2>, scalar_prefetch = 0 : i64, scratch_operands = 0 : i64, tpu.core_type = #tpu.core_type<tc>, window_params = [{transform_indices = @transform_0, window_bounds = array<i64: 2, 4>}, {transform_indices = @transform_1, window_bounds = array<i64: 4>}, {transform_indices = @transform_2, window_bounds = array<i64: 4>}, {transform_indices = @transform_3, window_bounds = array<i64: 1>}, {transform_indices = @transform_4, window_bounds = array<i64: 2, 256>}, {transform_indices = @transform_5, window_bounds = array<i64: 1, 256>}]} {
    %c0 = arith.constant 0 : index
    %c0_0 = arith.constant 0 : index
    %0 = vector.load %arg5[%c0, %c0_0] : memref<2x256xf32, #tpu.memory_space<vmem>>, vector<1x256xf32>
    %c1 = arith.constant 1 : index
    %c0_1 = arith.constant 0 : index
    %1 = vector.load %arg5[%c1, %c0_1] : memref<2x256xf32, #tpu.memory_space<vmem>>, vector<1x256xf32>
    %c0_2 = arith.constant 0 : index
    %2 = memref.load %arg4[%c0_2] : memref<1xf32, #tpu.memory_space<smem>>
    %3 = vector.broadcast %2 : f32 to vector<1x256xf32>
    %c0_3 = arith.constant 0 : index
    %c0_4 = arith.constant 0 : index
    %4 = memref.load %arg1[%c0_3, %c0_4] : memref<2x4xf32, #tpu.memory_space<smem>>
    %5 = vector.broadcast %4 : f32 to vector<1x256xf32>
    %6 = arith.mulf %0, %5 : vector<1x256xf32>
    %c1_5 = arith.constant 1 : index
    %c0_6 = arith.constant 0 : index
    %7 = memref.load %arg1[%c1_5, %c0_6] : memref<2x4xf32, #tpu.memory_space<smem>>
    %8 = vector.broadcast %7 : f32 to vector<1x256xf32>
    %9 = arith.mulf %1, %8 : vector<1x256xf32>
    %10 = arith.addf %6, %9 : vector<1x256xf32>
    %c0_7 = arith.constant 0 : index
    %11 = memref.load %arg2[%c0_7] : memref<4xf32, #tpu.memory_space<smem>>
    %12 = vector.broadcast %11 : f32 to vector<1x256xf32>
    %13 = arith.addf %10, %12 : vector<1x256xf32>
    %cst = arith.constant 0.000000e+00 : f32
    %14 = vector.broadcast %cst : f32 to vector<1x256xf32>
    %15 = arith.maximumf %13, %14 : vector<1x256xf32>
    %c0_8 = arith.constant 0 : index
    %16 = memref.load %arg3[%c0_8] : memref<4xf32, #tpu.memory_space<smem>>
    %17 = vector.broadcast %16 : f32 to vector<1x256xf32>
    %18 = arith.mulf %15, %17 : vector<1x256xf32>
    %19 = arith.addf %3, %18 : vector<1x256xf32>
    %c0_9 = arith.constant 0 : index
    %c1_10 = arith.constant 1 : index
    %20 = memref.load %arg1[%c0_9, %c1_10] : memref<2x4xf32, #tpu.memory_space<smem>>
    %21 = vector.broadcast %20 : f32 to vector<1x256xf32>
    %22 = arith.mulf %0, %21 : vector<1x256xf32>
    %c1_11 = arith.constant 1 : index
    %c1_12 = arith.constant 1 : index
    %23 = memref.load %arg1[%c1_11, %c1_12] : memref<2x4xf32, #tpu.memory_space<smem>>
    %24 = vector.broadcast %23 : f32 to vector<1x256xf32>
    %25 = arith.mulf %1, %24 : vector<1x256xf32>
    %26 = arith.addf %22, %25 : vector<1x256xf32>
    %c1_13 = arith.constant 1 : index
    %27 = memref.load %arg2[%c1_13] : memref<4xf32, #tpu.memory_space<smem>>
    %28 = vector.broadcast %27 : f32 to vector<1x256xf32>
    %29 = arith.addf %26, %28 : vector<1x256xf32>
    %cst_14 = arith.constant 0.000000e+00 : f32
    %30 = vector.broadcast %cst_14 : f32 to vector<1x256xf32>
    %31 = arith.maximumf %29, %30 : vector<1x256xf32>
    %c1_15 = arith.constant 1 : index
    %32 = memref.load %arg3[%c1_15] : memref<4xf32, #tpu.memory_space<smem>>
    %33 = vector.broadcast %32 : f32 to vector<1x256xf32>
    %34 = arith.mulf %31, %33 : vector<1x256xf32>
    %35 = arith.addf %19, %34 : vector<1x256xf32>
    %c0_16 = arith.constant 0 : index
    %c2 = arith.constant 2 : index
    %36 = memref.load %arg1[%c0_16, %c2] : memref<2x4xf32, #tpu.memory_space<smem>>
    %37 = vector.broadcast %36 : f32 to vector<1x256xf32>
    %38 = arith.mulf %0, %37 : vector<1x256xf32>
    %c1_17 = arith.constant 1 : index
    %c2_18 = arith.constant 2 : index
    %39 = memref.load %arg1[%c1_17, %c2_18] : memref<2x4xf32, #tpu.memory_space<smem>>
    %40 = vector.broadcast %39 : f32 to vector<1x256xf32>
    %41 = arith.mulf %1, %40 : vector<1x256xf32>
    %42 = arith.addf %38, %41 : vector<1x256xf32>
    %c2_19 = arith.constant 2 : index
    %43 = memref.load %arg2[%c2_19] : memref<4xf32, #tpu.memory_space<smem>>
    %44 = vector.broadcast %43 : f32 to vector<1x256xf32>
    %45 = arith.addf %42, %44 : vector<1x256xf32>
    %cst_20 = arith.constant 0.000000e+00 : f32
    %46 = vector.broadcast %cst_20 : f32 to vector<1x256xf32>
    %47 = arith.maximumf %45, %46 : vector<1x256xf32>
    %c2_21 = arith.constant 2 : index
    %48 = memref.load %arg3[%c2_21] : memref<4xf32, #tpu.memory_space<smem>>
    %49 = vector.broadcast %48 : f32 to vector<1x256xf32>
    %50 = arith.mulf %47, %49 : vector<1x256xf32>
    %51 = arith.addf %35, %50 : vector<1x256xf32>
    %c0_22 = arith.constant 0 : index
    %c3 = arith.constant 3 : index
    %52 = memref.load %arg1[%c0_22, %c3] : memref<2x4xf32, #tpu.memory_space<smem>>
    %53 = vector.broadcast %52 : f32 to vector<1x256xf32>
    %54 = arith.mulf %0, %53 : vector<1x256xf32>
    %c1_23 = arith.constant 1 : index
    %c3_24 = arith.constant 3 : index
    %55 = memref.load %arg1[%c1_23, %c3_24] : memref<2x4xf32, #tpu.memory_space<smem>>
    %56 = vector.broadcast %55 : f32 to vector<1x256xf32>
    %57 = arith.mulf %1, %56 : vector<1x256xf32>
    %58 = arith.addf %54, %57 : vector<1x256xf32>
    %c3_25 = arith.constant 3 : index
    %59 = memref.load %arg2[%c3_25] : memref<4xf32, #tpu.memory_space<smem>>
    %60 = vector.broadcast %59 : f32 to vector<1x256xf32>
    %61 = arith.addf %58, %60 : vector<1x256xf32>
    %cst_26 = arith.constant 0.000000e+00 : f32
    %62 = vector.broadcast %cst_26 : f32 to vector<1x256xf32>
    %63 = arith.maximumf %61, %62 : vector<1x256xf32>
    %c3_27 = arith.constant 3 : index
    %64 = memref.load %arg3[%c3_27] : memref<4xf32, #tpu.memory_space<smem>>
    %65 = vector.broadcast %64 : f32 to vector<1x256xf32>
    %66 = arith.mulf %63, %65 : vector<1x256xf32>
    %67 = arith.addf %51, %66 : vector<1x256xf32>
    %c0_28 = arith.constant 0 : index
    %c0_29 = arith.constant 0 : index
    %68 = vector.load %arg6[%c0_28, %c0_29] : memref<1x256xf32, #tpu.memory_space<vmem>>, vector<1x256xf32>
    tpu.vector_store %arg6[%c0_28, %c0_29], %67 {strides = array<i32>} : memref<1x256xf32, #tpu.memory_space<vmem>>, vector<1x256xf32>,
    return
  }
  func.func @transform_0(%arg0: i32) -> (i32, i32) {
    %c0_i32 = arith.constant 0 : i32
    %c0_i32_0 = arith.constant 0 : i32
    %c0_i32_1 = arith.constant 0 : i32
    return %c0_i32, %c0_i32_0 : i32, i32
  }
  func.func @transform_1(%arg0: i32) -> i32 {
    %c0_i32 = arith.constant 0 : i32
    %c0_i32_0 = arith.constant 0 : i32
    return %c0_i32 : i32
  }
  func.func @transform_2(%arg0: i32) -> i32 {
    %c0_i32 = arith.constant 0 : i32
    %c0_i32_0 = arith.constant 0 : i32
    return %c0_i32 : i32
  }
  func.func @transform_3(%arg0: i32) -> i32 {
    %c0_i32 = arith.constant 0 : i32
    %c0_i32_0 = arith.constant 0 : i32
    return %c0_i32 : i32
  }
  func.func @transform_4(%arg0: i32) -> (i32, i32) {
    %c0_i32 = arith.constant 0 : i32
    %c0_i32_0 = arith.constant 0 : i32
    return %c0_i32, %arg0 : i32, i32
  }
  func.func @transform_5(%arg0: i32) -> (i32, i32) {
    %c0_i32 = arith.constant 0 : i32
    %c0_i32_0 = arith.constant 0 : i32
    return %c0_i32, %arg0 : i32, i32
  }
}

</mosaic_0001>

<bundles_post_ra>
// kernel: tpu_custom_call.1
= control target key start
LH: loop header
LB: loop body
LE: loop exit
PB: predicated region body
PF: predicated region fallthrough
CT: control target
= control target key end

     0   :  { %s881_s0 = inlined_call_operand.vmem [shape: f32[2,4], index: 0, kind: input, shape index: {}]   ;;  %s882_s1 = inlined_call_operand.vmem [shape: f32[4], index: 1, kind: input, shape index: {}]   ;;  %s883_s2 = inlined_call_operand.vmem [shape: f32[4], index: 2, kind: input, shape index: {}]   ;;  %s884_s3 = inlined_call_operand.<no memory space> [shape: f32[1], index: 3, kind: input, shape index: {}]   ;;  %s885_s4 = inlined_call_operand.vmem [shape: f32[2,512], index: 4, kind: input, shape index: {}]   ;;  %s886_s5 = inlined_call_operand.hbm [shape: f32[1,512], index: 5, kind: output, shape index: {}]  }
   0x1   :  { %10 = sst [smem:[#allocation2]] %s884_s3 }
   0x2   :  { %11 = vsyncpa [#allocation5], 0 }
   0x3   :  { %12 = vsyncpa [#allocation7], 0 }
   0x4   :  { %13 = vsyncpa [#allocation4], 0 }
   0x5   :  { %15 = vsyncpa [#allocation4 + $0x1], 0  ;;  %s698_s20 = smov 0   ;;  %s700_s21 = smov 0  }
   0x6   :  { %s702_s22 = smov 0   ;;  %s704_s23 = smov 0  }
   0x7 LB: > { %s719_s3 = sadd.s32 4294967295, %s659_s23   ;;  %s441_s24 = sadd.s32 4294967294, %s659_s23   ;;  %s659_s23 = sphi %s704_s23, %s904_s23   ;;  %s655_s22 = sphi %s702_s22, %s903_s22   ;;  %s651_s21 = sphi %s700_s21, %s902_s21   ;;  %s647_s20 = sphi %s698_s20, %s901_s20  }
   0x8   : > { %s723_s25 = sadd.s32 1, %s659_s23   ;;  %s138_s26 = sadd.s32 1, %s655_s22 }
   0x9   : > { %s135_s27 = ssub.s32 %s659_s23, %s723_s25  ;;  %p148_p0 = scmp.ne.s32.totalorder %s655_s22, %s651_s21 }
   0xa   : > { %p136_p1 = scmp.eq.s32.totalorder %s135_s27, 0  ;;  %p149_p2 = scmp.eq.s32.totalorder %s719_s3, 1 }
   0xb   : > { %p154_p3 = scmp.ne.s32.totalorder %s651_s21, %s647_s20  ;;  %p155_p4 = scmp.eq.s32.totalorder %s441_s24, 1 }
   0xc   : > { %s734_s28 = scalar_select %p136_p1, %s655_s22, %s138_s26  }
   0xd   : > { %p736_p5 = por %p149_p2, %p148_p0  ;;  %p740_p6 = por %p155_p4, %p154_p3 }
   0xe   : > { %p442_p7 = scmp.ge.s32.totalorder %s659_s23, 1  ;;  %p162_p8 = scmp.lt.s32.totalorder %s659_s23, 3 }
   0xf   : > { %s890_s29 = scalar_select %p736_p5, 1, 0 }
  0x10   : > { %s891_s30 = scalar_select %p740_p6, 1, 0 }
  0x11   : > { %p887_p9 = scmp.eq.s32.totalorder %s719_s3, 0  ;;  %p747_p10 = pnand %p442_p7, %p162_p8 }
  0x12   : > { %s186_s9 = sshll.u32 %s882_s1, 4  ;;  %s175_s12 = sshll.u32 %s881_s0, 4  ;;  %s187_s9 = int_to_ptr.vmem [resolvable:$true] %s186_s9  ;;  %s176_s12 = int_to_ptr.vmem [resolvable:$true] %s175_s12 }
  0x13   : > { %s892_s6 = scalar_select %p747_p10, 1, 0 }
  0x14   : > { %p488_p11 = pneg %p747_p10  ;;  %s197_s16 = sshll.u32 %s883_s2, 4  ;;  %s768_s16 = int_to_ptr.vmem [resolvable:$true] %s197_s16 }
  0x15   : > { %s544_s17 = scalar_lea.vmem %s187_s9, 16  ;;  %p552_p3 = scmp.lt.s32.totalorder %s187_s9, %s187_s9 }
  0x16   : > { %p761_p12 = pnand %p887_p9, %p488_p11  ;;  %p545_p13 = scmp.ne.s32.totalorder %s187_s9, %s544_s17 }
  0x17   : > { %p553_p4 = scmp.lt.s32.totalorder %s544_s17, %s544_s17 }
  0x18   : > { %p546_p0 = pneg %p761_p12 }
  0x19   : > { %p554_p7 = por %p553_p4, %p552_p3 }
  0x1a   : > { %p547_p1 = pnand %p546_p0, %p545_p13 }
  0x1c   : > { %p548_p2 = pneg %p547_p1 }
  0x1e   : > { %p555_p8 = pnand %p554_p7, %p548_p2 }
  0x20   : > { %558 = shalt.err (!%p555_p8)
}
  0x21   : > { %s661_s18 = smov [#allocation6]   ;;  %s559_s19 = scalar_lea.vmem %s176_s12, 32 }
  0x22   : > { %494 = dma.vmem_to_smem (!%p761_p12), %s187_s9, 16, %s661_s18, [#allocation7]  }
  0x23   : > { %p560_p11 = scmp.ne.s32.totalorder %s176_s12, %s559_s19  ;;  %p567_p5 = scmp.lt.s32.totalorder %s176_s12, %s176_s12 }
  0x24   : > { %p568_p10 = scmp.lt.s32.totalorder %s559_s19, %s559_s19 }
  0x25   : > { %p562_p9 = pnand %p560_p11, %p546_p0 }
  0x26   : > { %p569_p13 = por %p568_p10, %p567_p5 }
  0x27   : > { %p563_p6 = pneg %p562_p9 }
  0x29   : > { %p570_p1 = pnand %p569_p13, %p563_p6 }
  0x2b   : > { %573 = shalt.err (!%p570_p1)
}
  0x2c   : > { %s662_s24 = smov [#allocation3]   ;;  %s574_s26 = scalar_lea.vmem %s768_s16, 16 }
  0x2d   : > { %491 = dma.vmem_to_smem (!%p761_p12), %s176_s12, 32, %s662_s24, [#allocation5]  }
  0x2e   : > { %p575_p2 = scmp.ne.s32.totalorder %s768_s16, %s574_s26  ;;  %p582_p9 = scmp.lt.s32.totalorder %s768_s16, %s768_s16 }
  0x2f   : > { %p583_p7 = scmp.lt.s32.totalorder %s574_s26, %s574_s26 }
  0x30   : > { %p577_p3 = pnand %p575_p2, %p546_p0 }
  0x31   : > { %p584_p5 = por %p583_p7, %p582_p9 }
  0x32   : > { %p578_p4 = pneg %p577_p3 }
  0x34   : > { %p585_p6 = pnand %p584_p5, %p578_p4 }
  0x36   : > { %588 = shalt.err (!%p585_p6)
}
  0x37   : > { %s663_s27 = smov [#allocation8]   ;;  %p894_p10 = scmp.ne.s32.totalorder %s892_s6, 0 }
  0x38   : > { %497 = dma.vmem_to_smem (!%p761_p12), %s768_s16, 16, %s663_s27, [#allocation7]  }
  0x39   : > { %222 = sbr.rel (%p894_p10) target bundleno = 114 (0x72), region = 40  ;;  %p895_p8 = scmp.eq.s32.totalorder (!%p894_p10), %s719_s3, 0 }
  0x40   : > { %634 = dma.done.wait (%p895_p8), [#allocation5], 32   ;;  %p896_p0 = pmov %p895_p8 }
  0x42   : > { %636 = vsyncadd (%p896_p0), [#allocation5], 4294967264  ;;  %p897_p11 = pmov %p896_p0 }
  0x43   : > { %p898_p13 = pmov %p896_p0 }
  0x44   : > { %638 = dma.done.wait (%p897_p11), [#allocation7], 32  }
  0x45   : > { %640 = vsyncadd (%p898_p13), [#allocation7], 4294967264 }
  0x46   : > { %236 = sfence }
  0x47   : > { %s452_s7 = sshll.u32 %s719_s3, 1  ;;  %s271_s8 = sld [smem:[#allocation3]]  ;;  %v331_v43 = vlaneseq }
  0x48   : > { %p260_p1 = scmp.lt.s32.totalorder %s452_s7, 3  ;;  %s455_s6 = sld [smem:[#allocation3 + $0x80]] }
  0x49   : > { %s278_s10 = sld [smem:[#allocation6]]  ;;  %s456_s15 = sld [smem:[#allocation3 + $0x1]]  ;;  %vm333_vm0 = vcmp.lt.s32.totalorder %v331_v43, 256 }
  0x4a   : > { %s906_s7 = smov (!%p260_p1, %s452_s7), 3  ;;  %s806_s14 = sld [smem:[#allocation8]] }
  0x4b   : > { %s453_s9 = sshll.u32 %s906_s7, 1  ;;  %s457_s16 = sld [smem:[#allocation3 + $0x81]] }
  0x4c   : > { %s263_s13 = scalar_lea.vmem %s885_s4, %s453_s9  ;;  %s808_s17 = sld [smem:[#allocation2]] }
  0x4d   : > { %v266_v0 = vld [vmem:[%s263_s13] ss:$2 sm:$0x3]  ;;  %v454_v1 = vld [vmem:[%s263_s13 + $0x1] ss:$2 sm:$0x3]  ;;  %v272_v2 = vstv %s271_s8 }
  0x4e   : > { %s810_s18 = sld [smem:[#allocation6 + $0x1]]  ;;  %v275_v3 = vstv %s455_s6  ;;  %s460_s19 = sld [smem:[#allocation3 + $0x2]]  ;;  %v273_v4 = vmul.f32 %v272_v2, %v266_v0 }
  0x4f   : > { %s461_s24 = sld [smem:[#allocation3 + $0x82]]  ;;  %v276_v5 = vmul.f32 %v454_v1, %v275_v3  ;;  %s812_s26 = sld [smem:[#allocation8 + $0x1]]  ;;  %v279_v6 = vstv %s278_s10  ;;  %v287_v8 = vstv %s456_s15 }
  0x50   : > { %s814_s27 = sld [smem:[#allocation6 + $0x2]]  ;;  %s464_s7 = sld [smem:[#allocation3 + $0x3]]  ;;  %v288_v11 = vmul.f32 %v287_v8, %v266_v0  ;;  %v283_v13 = vstv %s806_s14 }
  0x51   : > { %s465_s9 = sld [smem:[#allocation3 + $0x83]]  ;;  %v277_v7 = vadd.f32 %v276_v5, %v273_v4  ;;  %v290_v9 = vstv %s457_s16  ;;  %s818_s8 = sld [smem:[#allocation8 + $0x2]] }
  0x52   : > { %s816_s11 = sld [smem:[#allocation6 + $0x3]]  ;;  %v291_v12 = vmul.f32 %v454_v1, %v290_v9  ;;  %s256_s10 = sand.u32 1, %s651_s21   ;;  %v270_v21 = vstv %s808_s17 }
  0x53   : > { %v280_v10 = vadd.f32 %v279_v6, %v277_v7  ;;  %s822_s6 = sld [smem:[#allocation8 + $0x3]]  ;;  %s451_s12 = sshll.u32 %s256_s10, 1 }
  0x54   : > { %v294_v14 = vstv %s810_s18  ;;  %v302_v15 = vstv %s460_s19  ;;  %v292_v18 = vadd.f32 %v291_v12, %v288_v11  ;;  %s258_s13 = scalar_lea.vmem [#allocation9], %s451_s12  ;;  %s473_s15 = sshll.u32 %s719_s3, 5 }
  0x55   : > { %v305_v16 = vstv %s461_s24  ;;  %v281_v17 = vmax.f32 %v280_v10, 0.0  ;;  %v303_v19 = vmul.f32 %v302_v15, %v266_v0  ;;  %v298_v29 = vstv %s812_s26  ;;  %s351_s14 = sshll.u32 %s258_s13, 4  ;;  %s839_s18 = scalar_lea.hbm %s886_s5, %s473_s15  ;;  %s834_s14 = int_to_ptr.vmem [resolvable:$true] %s351_s14 }
  0x56   : > { %v306_v20 = vmul.f32 %v454_v1, %v305_v16  ;;  %v309_v22 = vstv %s814_s27  ;;  %v317_v23 = vstv %s464_s7  ;;  %v295_v26 = vadd.f32 %v294_v14, %v292_v18  ;;  %s337_s19 = scalar_lea.sflag [#allocation4], %s256_s10  ;;  %s589_s24 = scalar_lea.vmem %s834_s14, 32 }
  0x57   : > { %v320_v24 = vstv %s465_s9  ;;  %v284_v25 = vmul.f32 %v283_v13, %v281_v17  ;;  %v318_v28 = vmul.f32 %v317_v23, %v266_v0  ;;  %v313_v35 = vstv %s818_s8  ;;  %p590_p12 = scmp.ne.s32.totalorder %s834_s14, %s589_s24  ;;  %p899_p2 = scmp.ne.s32.totalorder %s890_s29, 0 }
  0x58   : > { %v307_v27 = vadd.f32 %v306_v20, %v303_v19  ;;  %v321_v30 = vmul.f32 %v454_v1, %v320_v24  ;;  %v296_v32 = vmax.f32 %v295_v26, 0.0  ;;  %v324_v34 = vstv %s816_s11  ;;  %s664_s3 = smov [#allocation9]  }
  0x59   : > { %v285_v31 = vadd.f32 %v284_v25, %v270_v21  ;;  %v328_v42 = vstv %s822_s6  ;;  %p591_p3 = pnand %p590_p12, %p899_p2  ;;  %s593_s26 = sshll.u32 %s664_s3, 4  ;;  %s594_s26 = int_to_ptr.vmem [resolvable:$false] %s593_s26 }
  0x5a   : > { %v310_v33 = vadd.f32 %v309_v22, %v307_v27  ;;  %v322_v36 = vadd.f32 %v321_v30, %v318_v28  ;;  %v299_v37 = vmul.f32 %v298_v29, %v296_v32  ;;  %s595_s27 = scalar_lea.vmem %s594_s26, 64  ;;  %p596_p9 = scmp.lt.s32.totalorder %s834_s14, %s594_s26 }
  0x5b   : > { %p592_p4 = pneg %p591_p3  ;;  %p597_p7 = scmp.lt.s32.totalorder %s595_s27, %s589_s24 }
  0x5c   : > { %v311_v38 = vmax.f32 %v310_v33, 0.0  ;;  %v325_v39 = vadd.f32 %v324_v34, %v322_v36  ;;  %v300_v40 = vadd.f32 %v299_v37, %v285_v31 }
  0x5d   : > { %p598_p5 = por %p597_p7, %p596_p9 }
  0x5e   : > { %v314_v41 = vmul.f32 %v313_v35, %v311_v38  ;;  %v326_v44 = vmax.f32 %v325_v39, 0.0 }
  0x5f   : > { %p599_p6 = pnand %p598_p5, %p592_p4 }
  0x60   : > { %v315_v45 = vadd.f32 %v314_v41, %v300_v40  ;;  %v329_v46 = vmul.f32 %v328_v42, %v326_v44 }
  0x62   : > { %v330_v47 = vadd.f32 %v329_v46, %v315_v45 }
  0x64   : > { %335 = vst.msk [vmem:[%s258_s13] sm:$0x3] %vm333_vm0, %v330_v47 }
  0x65   : > { %602 = shalt.err (!%p599_p6)
}
  0x66   : > { %s603_s7 = scalar_lea.hbm %s839_s18, 32  ;;  %s607_s8 = scalar_lea.hbm %s886_s5, 64 }
  0x67   : > { %p604_p10 = scmp.ne.s32.totalorder %s839_s18, %s603_s7  ;;  %p608_p11 = scmp.lt.u32.totalorder %s839_s18, %s886_s5 }
  0x68   : > { %p609_p13 = scmp.lt.u32.totalorder %s607_s8, %s603_s7  ;;  %p611_p12 = scmp.lt.u32.totalorder %s603_s7, %s839_s18 }
  0x69   : > { %p605_p8 = pnand %p604_p10, %p899_p2 }
  0x6a   : > { %p610_p1 = por %p609_p13, %p608_p11 }
  0x6b   : > { %p606_p0 = pneg %p605_p8 }
  0x6c   : > { %p612_p3 = por %p611_p12, %p610_p1 }
  0x6e   : > { %p613_p4 = pnand %p612_p3, %p606_p0 }
  0x70   : > { %616 = shalt.err (!%p613_p4)
}
  0x71   : > { %486 = dma.vmem_to_hbm [thread:$0]  (%p899_p2), %s834_s14, 32, %s839_s18, %s337_s19  }
  0x72 PF: > { %p508_p9 = scmp.ge.s32.totalorder %s659_s23, 2  ;;  %s363_s12 = sand.u32 1, %s647_s20  }
  0x73   : > { %p900_p7 = scmp.ne.s32.totalorder %s891_s30, 0  ;;  %s364_s13 = scalar_lea.sflag [#allocation4], %s363_s12 }
  0x75   : > { %p499_p5 = pnand %p508_p9, %p900_p7 }
  0x77   : > { %642 = dma.done.wait (!%p499_p5), %s364_s13, 32  }
  0x78   : > { %644 = vsyncadd (!%p499_p5), %s364_s13, 4294967264  ;;  %p18_p6 = scmp.ge.s32.totalorder %s723_s25, 4   ;;  %s901_s20 = smov %s651_s21 }
  0x79   : > { %s902_s21 = smov %s655_s22  ;;  %s903_s22 = smov %s734_s28 }
  0x7a   : > { %s904_s23 = smov %s723_s25  ;;  %20 = sbr.rel (!%p18_p6) target bundleno = 7 (0x7), region = 89 }
  0x81   :  { %369 = vsyncpa [#allocation4], 1 }
  0x82   :  { %371 = vsyncpa [#allocation4 + $0x1], 1 }
  0x83   :  { %372 = vsyncpa [#allocation5], 1 }
  0x84   :  { %374 = vsyncpa [#allocation5 + $0x1], 1 }
  0x85   :  { %375 = vsyncpa [#allocation7], 1 }

</bundles_post_ra>
